<compile_context>
chip_gen: v5e
topology: v5e:2x2
jax: 0.10.0
libtpu: 0.0.40
codegen_flags: <defaults>
</compile_context>

<pallas_src>
import functools

import jax
import jax.numpy as jnp
from jax.experimental import pallas as pl
from jax.experimental.pallas import tpu as pltpu


# ----------------------------------------------------------------------------
# Fused kernel: expand(1x1) -> depthwise(3x3, stride) -> project(1x1) [+ residual]
# ----------------------------------------------------------------------------
def _fused_block_kernel(*refs, stride, th, w_in, w_out, cout, expand, use_res):
    """One (batch, output-row-tile) step.

    refs = (x_ref, [w1, b1,] w2, b2, w3, b3, o_ref)
      x_ref : stride==1 -> (1, H+2, W,  Cin)   row-reflection-padded input (VMEM resident)
              stride==2 -> (4, H/2+1, W/2, Cin) even/odd row x col planes (ee, eo, oe, oo)
      o_ref : (th, Wo, Cout) output tile (batch dim squeezed)
    All BN scales are pre-folded into w1/w2/w3; b* are the folded biases (f32).
    """
    if expand:
        x_ref, w1_ref, b1_ref, w2_ref, b2_ref, w3_ref, b3_ref, o_ref = refs
    else:
        x_ref, w2_ref, b2_ref, w3_ref, b3_ref, o_ref = refs
        w1_ref = b1_ref = None

    t = pl.program_id(1)
    row0 = pl.multiple_of(t * th, th)          # window start (in de-interleaved row units)

    def expand_rows(x_rows):
        """1x1 expand conv (+ folded BN scale) + bias + ReLU on a row slab, f32 out."""
        r, wp, cin = x_rows.shape
        if expand:
            h = jnp.dot(x_rows.reshape(r * wp, cin), w1_ref[...],
                        preferred_element_type=jnp.float32)          # MXU
            h = jnp.maximum(h + b1_ref[...], 0.0)
            return h.reshape(r, wp, -1)
        return x_rows.astype(jnp.float32)

    w_dw = w2_ref[...]                          # (9, chid), BN scale folded

    if stride == 1:
        # th output rows need th+2 padded input rows (1-row halo each side).
        h = expand_rows(x_ref[0, pl.ds(row0, th + 2)])               # (th+2, W, chid)
        W = w_in
        # Left/right column-tap planes built ONCE (reflection at the borders):
        #   h_m1[:, j] = h[:, j-1] (j>=1), h_m1[:, 0]   = h[:, 1]
        #   h_p1[:, j] = h[:, j+1] (j<W-1), h_p1[:, W-1] = h[:, W-2]
        h_m1 = jnp.concatenate([h[:, 1:2, :], h[:, :W - 1, :]], axis=1)
        h_p1 = jnp.concatenate([h[:, 1:, :], h[:, W - 2:W - 1, :]], axis=1)
        cols = (h_m1, h, h_p1)
        acc = None
        for di in range(3):
            for dj in range(3):
                term = cols[dj][di:di + th] * w_dw[di * 3 + dj:di * 3 + dj + 1, :]
                acc = term if acc is None else acc + term
    else:
        # Planes were de-interleaved in the wrapper: 0=(even row, even col), 1=(e,o),
        # 2=(o,e), 3=(o,o).  Only the strided (even/even) outputs are ever computed.
        x_ee = x_ref[0, pl.ds(row0, th + 1)]
        x_eo = x_ref[1, pl.ds(row0, th + 1)]
        x_oe = x_ref[2, pl.ds(row0, th)]
        x_oo = x_ref[3, pl.ds(row0, th)]
        # One big expand matmul over all four windows (concat/split on the leading dim
        # is cheap) instead of four small ones.
        hcat = expand_rows(jnp.concatenate([x_ee, x_eo, x_oe, x_oo], axis=0))
        h_ee = hcat[:th + 1]
        h_eo = hcat[th + 1:2 * th + 2]
        h_oe = hcat[2 * th + 2:3 * th + 2]
        h_oo = hcat[3 * th + 2:]

        def shift_r(v):
            # Right-shift columns by one; column 0 replicates (== reflection for the
            # dj=0 tap at output column 0, which maps to input column 1 = odd plane 0).
            return jnp.concatenate([v[:, :1, :], v[:, :w_out - 1, :]], axis=1)

        ev_taps = (shift_r(h_eo), h_ee, h_eo)    # dj = 0, 1, 2 on even input rows
        od_taps = (shift_r(h_oo), h_oe, h_oo)    # dj = 0, 1, 2 on odd  input rows
        acc = None
        for di in range(3):
            src = od_taps if di == 1 else ev_taps
            lo = 1 if di == 2 else 0
            for dj in range(3):
                term = src[dj][lo:lo + th] * w_dw[di * 3 + dj:di * 3 + dj + 1, :]
                acc = term if acc is None else acc + term

    # Depthwise BN bias + ReLU (VPU, f32).
    y = jnp.maximum(acc + b2_ref[...], 0.0)                          # (th, Wo, chid)
    chid = y.shape[-1]

    # 1x1 project conv + BN bias (+ residual) (MXU).
    out = jnp.dot(y.reshape(th * w_out, chid).astype(w3_ref.dtype), w3_ref[...],
                  preferred_element_type=jnp.float32)
    out = out + b3_ref[...]
    if use_res:
        # Re-read the input rows right before the add (short live range); stride==1 so
        # output rows [t*th, t*th+th) == padded input rows [row0+1, row0+1+th).
        res = x_ref[0, pl.ds(row0 + 1, th)]
        out = out + res.reshape(th * w_out, cout).astype(jnp.float32)
    o_ref[...] = out.reshape(th, w_out, cout).astype(o_ref.dtype)


# ----------------------------------------------------------------------------
# Wrapper
# ----------------------------------------------------------------------------
def _vmem_capacity_bytes():
    """Per-core VMEM capacity; conservative fallback = v7x (64 MiB per TensorCore)."""
    try:
        info = pltpu.get_tpu_info()
        for name in ("vmem_capacity_bytes", "vmem_bytes", "vmem_size_bytes"):
            v = getattr(info, name, None)
            if v:
                return int(v)
    except Exception:
        pass
    return 64 << 20


def _pick_tile_rows(H, W, Ho, Wo, cin, chid, oup, stride, sbytes, budget):
    """Largest divisor of Ho whose *live* footprint fits the budget.

    Live footprint per step ~ resident input block (double-buffered) + ~5x the
    expanded window (h + two shifted tap planes + acc + slack) + double-buffered
    output blocks + weights.
    """
    in_block = 2 * (H + 4) * W * cin * sbytes
    weights = 4 * (cin * chid + 12 * chid + chid * oup + 2 * oup)

    def cost(th):
        rows = stride * th + (3 - stride)
        live = 5 * rows * W * chid * 4           # f32 hidden-window temporaries
        outb = 2 * th * Wo * oup * sbytes
        return in_block + weights + live + outb

    divisors = sorted((d for d in range(1, Ho + 1) if Ho % d == 0), reverse=True)
    for th in divisors:
        if cost(th) <= budget:
            return th
    return divisors[-1]


def inverted_residual_forward(x_nchw, params, *, inp, oup, stride,
                              tile_rows=None, storage_dtype=None):
    assert stride in (1, 2)
    use_res = (stride == 1) and (inp == oup)
    expand = params["expand"]
    chid = params["hidden"]

    x = jnp.transpose(x_nchw, (0, 2, 3, 1))      # NCHW -> NHWC (PyTorch boundary only)
    B, H, W, Cin = x.shape
    assert Cin == inp
    assert H >= 2 and W >= 2, "reflection pad needs at least 2 rows / columns"
    if stride == 2:
        assert H % 2 == 0 and W % 2 == 0, "stride-2 path assumes even H, W"
    Ho, Wo = (H, W) if stride == 1 else (H // 2, W // 2)

    sdt = jnp.dtype(storage_dtype) if storage_dtype is not None else x.dtype
    sbytes = sdt.itemsize
    x = x.astype(sdt)

    cap = _vmem_capacity_bytes()
    if tile_rows is None:
        tile_rows = _pick_tile_rows(H, W, Ho, Wo, Cin, chid, oup, stride, sbytes,
                                    budget=int(cap * 0.40))
    th = tile_rows
    assert Ho % th == 0, "tile_rows must divide the output height"

    # Fold eval-mode BN scales into the conv weights (one-time constant transform);
    # only the bias adds (and the ReLUs) remain in the kernel.
    if expand:
        w1 = (params["w1"] * params["s1"][None, :]).astype(sdt)
        b1 = params["b1"].reshape(1, chid).astype(jnp.float32)
    w2 = (params["w2"].reshape(9, chid) * params["s2"][None, :]).astype(jnp.float32)
    b2 = params["b2"].reshape(1, chid).astype(jnp.float32)
    w3 = (params["w3"] * params["s3"][None, :]).astype(sdt)
    b3 = params["b3"].reshape(1, oup).astype(jnp.float32)

    # 1-row top/bottom reflection pad of the NARROW input (cheap, pre-expansion);
    # W-axis reflection is handled in-kernel via the shifted tap planes.
    x_rp = jnp.pad(x, ((0, 0), (1, 1), (0, 0), (0, 0)), mode="reflect")
    if stride == 1:
        planes = x_rp[:, None]                                       # (B,1,H+2,W,Cin)
    else:
        # Hoist the stride-2 even/odd de-interleave out of the kernel entirely
        # (done once in XLA on the narrow input -> kernel only does aligned slices).
        planes = jnp.stack([x_rp[:, 0::2, 0::2], x_rp[:, 0::2, 1::2],
                            x_rp[:, 1::2, 0::2], x_rp[:, 1::2, 1::2]],
                           axis=1)                                    # (B,4,H/2+1,W/2,Cin)
    P, Hp, Wp = planes.shape[1:4]

    def _const(shape):
        return pl.BlockSpec(shape, lambda b, t: (0,) * len(shape))

    args = [planes]
    # Input block index depends only on the batch axis -> resident across row tiles,
    # auto double-buffered across batches by the BlockSpec pipeline (DMA fully hidden).
    in_specs = [pl.BlockSpec((None, P, Hp, Wp, Cin), lambda b, t: (b, 0, 0, 0, 0))]
    if expand:
        args += [w1, b1]
        in_specs += [_const((inp, chid)), _const((1, chid))]
    args += [w2, b2, w3, b3]
    in_specs += [_const((9, chid)), _const((1, chid)),
                 _const((chid, oup)), _const((1, oup))]

    kernel = functools.partial(_fused_block_kernel, stride=stride, th=th,
                               w_in=W, w_out=Wo, cout=oup,
                               expand=expand, use_res=use_res)

    out = pl.pallas_call(
        kernel,
        out_shape=jax.ShapeDtypeStruct((B, Ho, Wo, oup), sdt),
        grid=(B, Ho // th),
        in_specs=in_specs,
        out_specs=pl.BlockSpec((None, th, Wo, oup), lambda b, t: (b, t, 0, 0)),
        compiler_params=pltpu.CompilerParams(
            # Both axes parallel: independent tiles, lets megacore (v7x 2xTC) shard.
            dimension_semantics=("parallel", "parallel"),
            vmem_limit_bytes=int(min(cap * 3 // 4, 100 << 20))),
    )(*args)

    return jnp.transpose(out, (0, 3, 1, 2))      # NHWC -> NCHW


# ----------------------------------------------------------------------------
# Parameters (eval-mode BN folded into scale/bias)
# ----------------------------------------------------------------------------
def fold_bn(gamma, beta, mean, var, eps=1e-5):
    scale = gamma / jnp.sqrt(var + eps)
    bias = beta - mean * scale
    return scale, bias


def init_params(key, inp, oup, expand_ratio):
    hidden = int(round(inp * expand_ratio))
    ks = jax.random.split(key, 12)

    def bn(k, c):
        k1, k2, k3, k4 = jax.random.split(k, 4)
        gamma = 0.5 + jax.random.uniform(k1, (c,), jnp.float32)
        beta = 0.1 * jax.random.normal(k2, (c,), jnp.float32)
        mean = 0.1 * jax.random.normal(k3, (c,), jnp.float32)
        var = 0.5 + jax.random.uniform(k4, (c,), jnp.float32)
        return fold_bn(gamma, beta, mean, var)

    p = {"hidden": hidden, "expand": expand_ratio != 1}
    if expand_ratio != 1:
        p["w1"] = 0.1 * jax.random.normal(ks[0], (inp, hidden), jnp.float32)
        p["s1"], p["b1"] = bn(ks[1], hidden)
    p["w2"] = 0.1 * jax.random.normal(ks[2], (3, 3, hidden), jnp.float32)
    p["s2"], p["b2"] = bn(ks[3], hidden)
    p["w3"] = 0.1 * jax.random.normal(ks[4], (hidden, oup), jnp.float32)
    p["s3"], p["b3"] = bn(ks[5], oup)
    return p


# ----------------------------------------------------------------------------
# Pure-JAX reference (numerical verification)
# ----------------------------------------------------------------------------
def reference_forward(x_nchw, params, *, inp, oup, stride):
    use_res = (stride == 1) and (inp == oup)
    x = jnp.transpose(x_nchw, (0, 2, 3, 1))
    h = x
    if params["expand"]:
        h = jnp.maximum(jnp.einsum("bhwc,cd->bhwd", h, params["w1"]) * params["s1"]
                        + params["b1"], 0.0)
    B, H, W, C = h.shape
    hp = jnp.pad(h, ((0, 0), (1, 1), (1, 1), (0, 0)), mode="reflect")
    acc = jnp.zeros_like(h)
    for di in range(3):
        for dj in range(3):
            acc = acc + hp[:, di:di + H, dj:dj + W, :] * params["w2"][di, dj]
    h = jnp.maximum(acc * params["s2"] + params["b2"], 0.0)
    if stride == 2:
        h = h[:, ::2, ::2, :]
    out = jnp.einsum("bhwc,cd->bhwd", h, params["w3"]) * params["s3"] + params["b3"]
    if use_res:
        out = out + x
    return jnp.transpose(out, (0, 3, 1, 2))


# ----------------------------------------------------------------------------
if __name__ == "__main__":
    key = jax.random.PRNGKey(0)

    def run_case(name, key, *, B, inp, oup, H, W, expand_ratio, stride,
                 tile_rows=None, storage_dtype=None, atol=1e-2):
        kx, kp, key = jax.random.split(key, 3)
        x = jax.random.normal(kx, (B, inp, H, W), jnp.float32)   # NCHW like PyTorch
        params = init_params(kp, inp, oup, expand_ratio)
        out = inverted_residual_forward(x, params, inp=inp, oup=oup, stride=stride,
                                        tile_rows=tile_rows,
                                        storage_dtype=storage_dtype)
        out = jax.block_until_ready(out)
        Ho, Wo = (H, W) if stride == 1 else (H // 2, W // 2)
        assert out.shape == (B, oup, Ho, Wo), (name, out.shape)
        ref = reference_forward(x, params, inp=inp, oup=oup, stride=stride)
        # Tolerances are set loose enough to absorb MXU pass-count / dtype-storage
        # differences vs the XLA reference while still catching any structural bug
        # (wrong padding / stride / residual would be O(0.1..1) off).
        err = float(jnp.max(jnp.abs(out.astype(jnp.float32) - ref)))
        assert err <= atol, f"config {name}: max abs error {err} > {atol}"
        return key

    # A) expand=4, stride=1, residual; tile_rows=8 forces 2 row tiles per image so the
    #    top-reflection, interior, and bottom-reflection windows are all exercised.
    key = run_case("A", key, B=2, inp=4, oup=4, H=16, W=16, expand_ratio=4, stride=1,
                   tile_rows=8)
    # B) expand_ratio=1 (no expand conv), inp != oup -> no residual; full-height tile.
    key = run_case("B", key, B=2, inp=4, oup=8, H=16, W=16, expand_ratio=1, stride=1)
    # C) stride=2 path (wrapper-side even/odd de-interleave, strided outputs only).
    key = run_case("C", key, B=2, inp=4, oup=8, H=16, W=16, expand_ratio=4, stride=2)
    # D) bf16 storage + f32 accumulation (v6e/v7x MXU fast path); looser tolerance.
    key = run_case("D", key, B=2, inp=4, oup=4, H=16, W=16, expand_ratio=4, stride=1,
                   storage_dtype=jnp.bfloat16, atol=0.15)

    print("KERNEL_OK")
</pallas_src>

<mosaic_0001>
module attributes {stable_mosaic.version = 11 : i64} {
  func.func @_fused_block_kernel(%arg0: i32, %arg1: i32, %arg2: memref<1x1x18x16x4xf32, #tpu.memory_space<vmem>>, %arg3: memref<4x16xf32, #tpu.memory_space<vmem>>, %arg4: memref<1x16xf32, #tpu.memory_space<vmem>>, %arg5: memref<9x16xf32, #tpu.memory_space<vmem>>, %arg6: memref<1x16xf32, #tpu.memory_space<vmem>>, %arg7: memref<16x4xf32, #tpu.memory_space<vmem>>, %arg8: memref<1x4xf32, #tpu.memory_space<vmem>>, %arg9: memref<1x8x16x4xf32, #tpu.memory_space<vmem>>) attributes {dimension_semantics = [#tpu.dimension_semantics<parallel>, #tpu.dimension_semantics<parallel>], iteration_bounds = array<i64: 2, 2>, scalar_prefetch = 0 : i64, scratch_operands = 0 : i64, tpu.core_type = #tpu.core_type<tc>, window_params = [{transform_indices = @transform_0, window_bounds = array<i64: 1, 1, 18, 16, 4>}, {pipeline_mode = #tpu.pipeline_mode<synchronous>, transform_indices = @transform_1, window_bounds = array<i64: 4, 16>}, {pipeline_mode = #tpu.pipeline_mode<synchronous>, transform_indices = @transform_2, window_bounds = array<i64: 1, 16>}, {pipeline_mode = #tpu.pipeline_mode<synchronous>, transform_indices = @transform_3, window_bounds = array<i64: 9, 16>}, {pipeline_mode = #tpu.pipeline_mode<synchronous>, transform_indices = @transform_4, window_bounds = array<i64: 1, 16>}, {pipeline_mode = #tpu.pipeline_mode<synchronous>, transform_indices = @transform_5, window_bounds = array<i64: 16, 4>}, {pipeline_mode = #tpu.pipeline_mode<synchronous>, transform_indices = @transform_6, window_bounds = array<i64: 1, 4>}, {transform_indices = @transform_7, window_bounds = array<i64: 1, 8, 16, 4>}]} {
    %c8_i32 = arith.constant 8 : i32
    %0 = arith.muli %arg1, %c8_i32 : i32
    %1 = tpu.assume_multiple %0, 8 : i32
    %c0 = arith.constant 0 : index
    %c0_0 = arith.constant 0 : index
    %2 = vector.load %arg5[%c0, %c0_0] : memref<9x16xf32, #tpu.memory_space<vmem>>, vector<9x16xf32>
    %c0_1 = arith.constant 0 : index
    %c0_2 = arith.constant 0 : index
    %3 = arith.index_cast %1 : i32 to index
    %c0_3 = arith.constant 0 : index
    %c0_4 = arith.constant 0 : index
    %4 = vector.load %arg2[%c0_1, %c0_2, %3, %c0_3, %c0_4] : memref<1x1x18x16x4xf32, #tpu.memory_space<vmem>>, vector<1x1x10x16x4xf32>
    %5 = vector.shape_cast %4 : vector<1x1x10x16x4xf32> to vector<10x16x4xf32>
    %6 = vector.shape_cast %5 : vector<10x16x4xf32> to vector<160x4xf32>
    %c0_5 = arith.constant 0 : index
    %c0_6 = arith.constant 0 : index
    %7 = vector.load %arg3[%c0_5, %c0_6] : memref<4x16xf32, #tpu.memory_space<vmem>>, vector<4x16xf32>
    %cst = arith.constant dense<0.000000e+00> : vector<160x16xf32>
    %8 = tpu.matmul %6, %7, %cst {dimension_numbers = #tpu.dot_dimension_numbers<[1], [0], [0], [1], [0, 0, 1, 1], [], []>} : vector<160x4xf32>, vector<4x16xf32>, vector<160x16xf32> -> vector<160x16xf32>
    %c0_7 = arith.constant 0 : index
    %c0_8 = arith.constant 0 : index
    %9 = vector.load %arg4[%c0_7, %c0_8] : memref<1x16xf32, #tpu.memory_space<vmem>>, vector<1x16xf32>
    %10 = vector.broadcast %9 : vector<1x16xf32> to vector<160x16xf32>
    %11 = arith.addf %8, %10 : vector<160x16xf32>
    %cst_9 = arith.constant 0.000000e+00 : f32
    %12 = vector.broadcast %cst_9 : f32 to vector<160x16xf32>
    %13 = arith.maximumf %11, %12 : vector<160x16xf32>
    %14 = vector.shape_cast %13 : vector<160x16xf32> to vector<10x16x16xf32>
    %15 = vector.extract_strided_slice %14 {offsets = [0, 1, 0], sizes = [10, 1, 16], strides = [1, 1, 1]} : vector<10x16x16xf32> to vector<10x1x16xf32>
    %16 = vector.extract_strided_slice %14 {offsets = [0, 0, 0], sizes = [10, 15, 16], strides = [1, 1, 1]} : vector<10x16x16xf32> to vector<10x15x16xf32>
    %17 = tpu.concatenate %15, %16 in 1 : vector<10x1x16xf32>, vector<10x15x16xf32> -> vector<10x16x16xf32>
    %18 = vector.extract_strided_slice %14 {offsets = [0, 1, 0], sizes = [10, 15, 16], strides = [1, 1, 1]} : vector<10x16x16xf32> to vector<10x15x16xf32>
    %19 = vector.extract_strided_slice %14 {offsets = [0, 14, 0], sizes = [10, 1, 16], strides = [1, 1, 1]} : vector<10x16x16xf32> to vector<10x1x16xf32>
    %20 = tpu.concatenate %18, %19 in 1 : vector<10x15x16xf32>, vector<10x1x16xf32> -> vector<10x16x16xf32>
    %21 = vector.extract_strided_slice %17 {offsets = [0, 0, 0], sizes = [8, 16, 16], strides = [1, 1, 1]} : vector<10x16x16xf32> to vector<8x16x16xf32>
    %22 = vector.extract_strided_slice %2 {offsets = [0, 0], sizes = [1, 16], strides = [1, 1]} : vector<9x16xf32> to vector<1x16xf32>
    %23 = vector.shape_cast %22 : vector<1x16xf32> to vector<1x1x16xf32>
    %24 = vector.broadcast %23 : vector<1x1x16xf32> to vector<8x16x16xf32>
    %25 = arith.mulf %21, %24 : vector<8x16x16xf32>
    %26 = vector.extract_strided_slice %14 {offsets = [0, 0, 0], sizes = [8, 16, 16], strides = [1, 1, 1]} : vector<10x16x16xf32> to vector<8x16x16xf32>
    %27 = vector.extract_strided_slice %2 {offsets = [1, 0], sizes = [1, 16], strides = [1, 1]} : vector<9x16xf32> to vector<1x16xf32>
    %28 = vector.shape_cast %27 : vector<1x16xf32> to vector<1x1x16xf32>
    %29 = vector.broadcast %28 : vector<1x1x16xf32> to vector<8x16x16xf32>
    %30 = arith.mulf %26, %29 : vector<8x16x16xf32>
    %31 = arith.addf %25, %30 : vector<8x16x16xf32>
    %32 = vector.extract_strided_slice %20 {offsets = [0, 0, 0], sizes = [8, 16, 16], strides = [1, 1, 1]} : vector<10x16x16xf32> to vector<8x16x16xf32>
    %33 = vector.extract_strided_slice %2 {offsets = [2, 0], sizes = [1, 16], strides = [1, 1]} : vector<9x16xf32> to vector<1x16xf32>
    %34 = vector.shape_cast %33 : vector<1x16xf32> to vector<1x1x16xf32>
    %35 = vector.broadcast %34 : vector<1x1x16xf32> to vector<8x16x16xf32>
    %36 = arith.mulf %32, %35 : vector<8x16x16xf32>
    %37 = arith.addf %31, %36 : vector<8x16x16xf32>
    %38 = vector.extract_strided_slice %17 {offsets = [1, 0, 0], sizes = [8, 16, 16], strides = [1, 1, 1]} : vector<10x16x16xf32> to vector<8x16x16xf32>
    %39 = vector.extract_strided_slice %2 {offsets = [3, 0], sizes = [1, 16], strides = [1, 1]} : vector<9x16xf32> to vector<1x16xf32>
    %40 = vector.shape_cast %39 : vector<1x16xf32> to vector<1x1x16xf32>
    %41 = vector.broadcast %40 : vector<1x1x16xf32> to vector<8x16x16xf32>
    %42 = arith.mulf %38, %41 : vector<8x16x16xf32>
    %43 = arith.addf %37, %42 : vector<8x16x16xf32>
    %44 = vector.extract_strided_slice %14 {offsets = [1, 0, 0], sizes = [8, 16, 16], strides = [1, 1, 1]} : vector<10x16x16xf32> to vector<8x16x16xf32>
    %45 = vector.extract_strided_slice %2 {offsets = [4, 0], sizes = [1, 16], strides = [1, 1]} : vector<9x16xf32> to vector<1x16xf32>
    %46 = vector.shape_cast %45 : vector<1x16xf32> to vector<1x1x16xf32>
    %47 = vector.broadcast %46 : vector<1x1x16xf32> to vector<8x16x16xf32>
    %48 = arith.mulf %44, %47 : vector<8x16x16xf32>
    %49 = arith.addf %43, %48 : vector<8x16x16xf32>
    %50 = vector.extract_strided_slice %20 {offsets = [1, 0, 0], sizes = [8, 16, 16], strides = [1, 1, 1]} : vector<10x16x16xf32> to vector<8x16x16xf32>
    %51 = vector.extract_strided_slice %2 {offsets = [5, 0], sizes = [1, 16], strides = [1, 1]} : vector<9x16xf32> to vector<1x16xf32>
    %52 = vector.shape_cast %51 : vector<1x16xf32> to vector<1x1x16xf32>
    %53 = vector.broadcast %52 : vector<1x1x16xf32> to vector<8x16x16xf32>
    %54 = arith.mulf %50, %53 : vector<8x16x16xf32>
    %55 = arith.addf %49, %54 : vector<8x16x16xf32>
    %56 = vector.extract_strided_slice %17 {offsets = [2, 0, 0], sizes = [8, 16, 16], strides = [1, 1, 1]} : vector<10x16x16xf32> to vector<8x16x16xf32>
    %57 = vector.extract_strided_slice %2 {offsets = [6, 0], sizes = [1, 16], strides = [1, 1]} : vector<9x16xf32> to vector<1x16xf32>
    %58 = vector.shape_cast %57 : vector<1x16xf32> to vector<1x1x16xf32>
    %59 = vector.broadcast %58 : vector<1x1x16xf32> to vector<8x16x16xf32>
    %60 = arith.mulf %56, %59 : vector<8x16x16xf32>
    %61 = arith.addf %55, %60 : vector<8x16x16xf32>
    %62 = vector.extract_strided_slice %14 {offsets = [2, 0, 0], sizes = [8, 16, 16], strides = [1, 1, 1]} : vector<10x16x16xf32> to vector<8x16x16xf32>
    %63 = vector.extract_strided_slice %2 {offsets = [7, 0], sizes = [1, 16], strides = [1, 1]} : vector<9x16xf32> to vector<1x16xf32>
    %64 = vector.shape_cast %63 : vector<1x16xf32> to vector<1x1x16xf32>
    %65 = vector.broadcast %64 : vector<1x1x16xf32> to vector<8x16x16xf32>
    %66 = arith.mulf %62, %65 : vector<8x16x16xf32>
    %67 = arith.addf %61, %66 : vector<8x16x16xf32>
    %68 = vector.extract_strided_slice %20 {offsets = [2, 0, 0], sizes = [8, 16, 16], strides = [1, 1, 1]} : vector<10x16x16xf32> to vector<8x16x16xf32>
    %69 = vector.extract_strided_slice %2 {offsets = [8, 0], sizes = [1, 16], strides = [1, 1]} : vector<9x16xf32> to vector<1x16xf32>
    %70 = vector.shape_cast %69 : vector<1x16xf32> to vector<1x1x16xf32>
    %71 = vector.broadcast %70 : vector<1x1x16xf32> to vector<8x16x16xf32>
    %72 = arith.mulf %68, %71 : vector<8x16x16xf32>
    %73 = arith.addf %67, %72 : vector<8x16x16xf32>
    %c0_10 = arith.constant 0 : index
    %c0_11 = arith.constant 0 : index
    %74 = vector.load %arg6[%c0_10, %c0_11] : memref<1x16xf32, #tpu.memory_space<vmem>>, vector<1x16xf32>
    %75 = vector.shape_cast %74 : vector<1x16xf32> to vector<1x1x16xf32>
    %76 = vector.broadcast %75 : vector<1x1x16xf32> to vector<8x16x16xf32>
    %77 = arith.addf %73, %76 : vector<8x16x16xf32>
    %cst_12 = arith.constant 0.000000e+00 : f32
    %78 = vector.broadcast %cst_12 : f32 to vector<8x16x16xf32>
    %79 = arith.maximumf %77, %78 : vector<8x16x16xf32>
    %80 = vector.shape_cast %79 : vector<8x16x16xf32> to vector<128x16xf32>
    %c0_13 = arith.constant 0 : index
    %c0_14 = arith.constant 0 : index
    %81 = vector.load %arg7[%c0_13, %c0_14] : memref<16x4xf32, #tpu.memory_space<vmem>>, vector<16x4xf32>
    %cst_15 = arith.constant dense<0.000000e+00> : vector<128x4xf32>
    %82 = tpu.matmul %80, %81, %cst_15 {dimension_numbers = #tpu.dot_dimension_numbers<[1], [0], [0], [1], [0, 0, 1, 1], [], []>} : vector<128x16xf32>, vector<16x4xf32>, vector<128x4xf32> -> vector<128x4xf32>
    %c0_16 = arith.constant 0 : index
    %c0_17 = arith.constant 0 : index
    %83 = vector.load %arg8[%c0_16, %c0_17] : memref<1x4xf32, #tpu.memory_space<vmem>>, vector<1x4xf32>
    %84 = vector.broadcast %83 : vector<1x4xf32> to vector<128x4xf32>
    %85 = arith.addf %82, %84 : vector<128x4xf32>
    %c1_i32 = arith.constant 1 : i32
    %86 = arith.addi %1, %c1_i32 : i32
    %c0_18 = arith.constant 0 : index
    %c0_19 = arith.constant 0 : index
    %87 = arith.index_cast %86 : i32 to index
    %c0_20 = arith.constant 0 : index
    %c0_21 = arith.constant 0 : index
    %88 = vector.load %arg2[%c0_18, %c0_19, %87, %c0_20, %c0_21] : memref<1x1x18x16x4xf32, #tpu.memory_space<vmem>>, vector<1x1x8x16x4xf32>
    %89 = vector.shape_cast %88 : vector<1x1x8x16x4xf32> to vector<8x16x4xf32>
    %90 = vector.shape_cast %89 : vector<8x16x4xf32> to vector<128x4xf32>
    %91 = arith.addf %85, %90 : vector<128x4xf32>
    %92 = vector.shape_cast %91 : vector<128x4xf32> to vector<8x16x4xf32>
    %c0_22 = arith.constant 0 : index
    %c0_23 = arith.constant 0 : index
    %c0_24 = arith.constant 0 : index
    %c0_25 = arith.constant 0 : index
    %93 = vector.load %arg9[%c0_22, %c0_23, %c0_24, %c0_25] : memref<1x8x16x4xf32, #tpu.memory_space<vmem>>, vector<1x8x16x4xf32>
    %94 = vector.shape_cast %93 : vector<1x8x16x4xf32> to vector<8x16x4xf32>
    %95 = vector.shape_cast %92 : vector<8x16x4xf32> to vector<1x8x16x4xf32>
    tpu.vector_store %arg9[%c0_22, %c0_23, %c0_24, %c0_25], %95 {strides = array<i32>} : memref<1x8x16x4xf32, #tpu.memory_space<vmem>>, vector<1x8x16x4xf32>,
    return
  }
  func.func @transform_0(%arg0: i32, %arg1: i32) -> (i32, i32, i32, i32, i32) {
    %c0_i32 = arith.constant 0 : i32
    %c0_i32_0 = arith.constant 0 : i32
    %c0_i32_1 = arith.constant 0 : i32
    %c0_i32_2 = arith.constant 0 : i32
    %c0_i32_3 = arith.constant 0 : i32
    return %arg0, %c0_i32, %c0_i32_0, %c0_i32_1, %c0_i32_2 : i32, i32, i32, i32, i32
  }
  func.func @transform_1(%arg0: i32, %arg1: i32) -> (i32, i32) {
    %c0_i32 = arith.constant 0 : i32
    %c0_i32_0 = arith.constant 0 : i32
    %c0_i32_1 = arith.constant 0 : i32
    return %c0_i32, %c0_i32_0 : i32, i32
  }
  func.func @transform_2(%arg0: i32, %arg1: i32) -> (i32, i32) {
    %c0_i32 = arith.constant 0 : i32
    %c0_i32_0 = arith.constant 0 : i32
    %c0_i32_1 = arith.constant 0 : i32
    return %c0_i32, %c0_i32_0 : i32, i32
  }
  func.func @transform_3(%arg0: i32, %arg1: i32) -> (i32, i32) {
    %c0_i32 = arith.constant 0 : i32
    %c0_i32_0 = arith.constant 0 : i32
    %c0_i32_1 = arith.constant 0 : i32
    return %c0_i32, %c0_i32_0 : i32, i32
  }
  func.func @transform_4(%arg0: i32, %arg1: i32) -> (i32, i32) {
    %c0_i32 = arith.constant 0 : i32
    %c0_i32_0 = arith.constant 0 : i32
    %c0_i32_1 = arith.constant 0 : i32
    return %c0_i32, %c0_i32_0 : i32, i32
  }
  func.func @transform_5(%arg0: i32, %arg1: i32) -> (i32, i32) {
    %c0_i32 = arith.constant 0 : i32
    %c0_i32_0 = arith.constant 0 : i32
    %c0_i32_1 = arith.constant 0 : i32
    return %c0_i32, %c0_i32_0 : i32, i32
  }
  func.func @transform_6(%arg0: i32, %arg1: i32) -> (i32, i32) {
    %c0_i32 = arith.constant 0 : i32
    %c0_i32_0 = arith.constant 0 : i32
    %c0_i32_1 = arith.constant 0 : i32
    return %c0_i32, %c0_i32_0 : i32, i32
  }
  func.func @transform_7(%arg0: i32, %arg1: i32) -> (i32, i32, i32, i32) {
    %c0_i32 = arith.constant 0 : i32
    %c0_i32_0 = arith.constant 0 : i32
    %c0_i32_1 = arith.constant 0 : i32
    return %arg0, %arg1, %c0_i32, %c0_i32_0 : i32, i32, i32, i32
  }
}

</mosaic_0001>

<bundles_post_ra>
// kernel: tpu_custom_call.1
= control target key start
LH: loop header
LB: loop body
LE: loop exit
PB: predicated region body
PF: predicated region fallthrough
CT: control target
= control target key end

     0   :  { %s1442_s24 = smov 0   ;;  %s1444_s25 = smov 0   ;;  %s2233_s0 = inlined_call_operand.vmem [shape: f32[2,1,18,16,4], index: 0, kind: input, shape index: {}]   ;;  %s2234_s1 = inlined_call_operand.vmem [shape: f32[4,16], index: 1, kind: input, shape index: {}]   ;;  %s2235_s2 = inlined_call_operand.vmem [shape: f32[1,16], index: 2, kind: input, shape index: {}]   ;;  %s2236_s3 = inlined_call_operand.vmem [shape: f32[9,16], index: 3, kind: input, shape index: {}]   ;;  %s2237_s4 = inlined_call_operand.vmem [shape: f32[1,16], index: 4, kind: input, shape index: {}]   ;;  %s2238_s5 = inlined_call_operand.vmem [shape: f32[16,4], index: 5, kind: input, shape index: {}]   ;;  %s2239_s6 = inlined_call_operand.vmem [shape: f32[1,4], index: 6, kind: input, shape index: {}]   ;;  %s2240_s7 = inlined_call_operand.vmem [shape: f32[2,16,16,4], index: 7, kind: output, shape index: {}]  }
   0x1   :  { %s1446_s26 = smov 0   ;;  %s1448_s27 = smov 0  }
   0x2   :  { %s1450_s28 = smov 0  }
   0x3 LB: > { %s26_s29 = sadd.s32 1, %s1392_s26  ;;  %s29_s30 = sadd.s32 1, %s1396_s27  ;;  %s1400_s28 = sphi %s1450_s28, %s17_s28   ;;  %s1396_s27 = sphi %s1448_s27, %s2325_s27   ;;  %s1392_s26 = sphi %s1446_s26, %s2324_s26   ;;  %s1388_s25 = sphi %s1444_s25, %s2323_s25   ;;  %s1384_s24 = sphi %s1442_s24, %s2322_s24  }
   0x4   : > { %p27_p0 = scmp.ge.s32.totalorder %s26_s29, 2  ;;  %p1246_p1 = scmp.ge.s32.totalorder %s1400_s28, 1 }
   0x5   : > { %p251_p2 = scmp.lt.s32.totalorder %s1400_s28, 5 }
   0x6   : > { %s2327_s29 = smov (%p27_p0, %s26_s29), 0  ;;  %s2329_s30 = smov (!%p27_p0, %s29_s30), %s1396_s27 }
   0x7   : > { %p252_p3 = pnand %p1246_p1, %p251_p2  ;;  %p31_p4 = scmp.ge.s32.totalorder %s2329_s30, 2 }
   0x9   : > { %s2331_s30 = smov (%p31_p4, %s2329_s30), 0  ;;  %255 = sbr.rel (%p252_p3) target bundleno = 437 (0x1b5), region = 48 }
   0xe   : > { %v329_v0 = vld [vmem:[%s2234_s1] sm:$0xf]  ;;  %vm395_vm0 = vcmask 1043456   ;;  %p288_p5 = scmp.lt.s32.totalorder %s1388_s25, 1  ;;  %s1311_s11 = sshll.u32 %s1384_s24, 7  ;;  %vm334_vm1 = vcmask 31744  }
   0xf   : > { %1254 = vmatpush.msk.msra.mxu0 %vm395_vm0, %v329_v0  ;;  %1313 = vmatpush.msk.msra.mxu2 %vm395_vm0, %v329_v0  ;;  %v1529_v23 = vld [vmem:[%s2235_s2] ss:$0 sm:$0xff]  ;;  %vm536_vm2 = vcmask 1040384   ;;  %v976_v38 = vld [vmem:[%s2238_s5 + $0x8] sm:$0xff]  ;;  %vm597_vm3 = vcmask 1046528   ;;  %vm981_vm4 = vcmask 130048  }
  0x10   : > { %s2333_s25 = smov (!%p288_p5, %s1388_s25), 1  ;;  %1314 = vmatpush.msk.msra.mxu3 %vm395_vm0, %v329_v0  ;;  %v305_v39 = vld [vmem:[%s2236_s3] sm:$0xff]  ;;  %1044 = vmatpush.msra.mxu1 %v976_v38  ;;  %s1248_s12 = sshll.u32 %s1384_s24, 3 }
  0x11   : > { %s1317_s10 = smul.u32 288, %s2333_s25  ;;  %v1544_v42 = vperm.slane %v305_v39, 0  ;;  %v975_v45 = vld [vmem:[%s2238_s5] sm:$0xff]  ;;  %v1557_v51 = vperm.slane %v305_v39, 1  ;;  %v1560_v53 = vperm.slane %v305_v39, 2  ;;  %v1564_v56 = vperm.slane %v305_v39, 3 }
  0x12   : > { %1315 = vmatpush.msrb.mxu3 %v976_v38  ;;  %1045 = vmatpush.msra.mxu1 %v975_v45  ;;  %p296_p6 = scmp.lt.s32.totalorder %s1248_s12, 15 }
  0x13   : > { %s292_s14 = scalar_lea.vmem %s2233_s0, %s1317_s10 }
  0x14   : > { %s1484_s15 = scalar_lea.vmem %s292_s14, %s1311_s11  ;;  %1316 = vmatpush.msrb.mxu3 %v975_v45  ;;  %s2335_s12 = smov (!%p296_p6, %s1248_s12), 15 }
  0x15   : > { %v309_v1 = vld [vmem:[%s1484_s15] sm:$0xff]  ;;  %v318_v2 = vld [vmem:[%s1484_s15 + $0x48] sm:$0xff]  ;;  %v319_v4 = vld [vmem:[%s1484_s15 + $0x50] sm:$0xff]  ;;  %s1249_s13 = sshll.u32 %s2335_s12, 1  ;;  %s1250_s14 = sshll.u32 %s2333_s25, 5 }
  0x16   : > { %1255 = vmatmul.msk.f32.vlgmr.msra.gmra.mxu0 %vm334_vm1, %v309_v1  ;;  %1264 = vmatmul.msk.f32.vlgmr.msra.gmra.mxu2 %vm334_vm1, %v318_v2  ;;  %v310_v3 = vld [vmem:[%s1484_s15 + $0x8] sm:$0xff]  ;;  %v311_v5 = vld [vmem:[%s1484_s15 + $0x10] sm:$0xff]  ;;  %v320_v6 = vld [vmem:[%s1484_s15 + $0x58] sm:$0xff]  ;;  %s300_s16 = sadd.s32 %s1250_s14, %s1249_s13 }
  0x17   : > { %v312_v7 = vld [vmem:[%s1484_s15 + $0x18] sm:$0xff]  ;;  %v321_v8 = vld [vmem:[%s1484_s15 + $0x60] sm:$0xff]  ;;  %v322_v10 = vld [vmem:[%s1484_s15 + $0x68] sm:$0xff]  ;;  %s1251_s19 = sshll.u32 %s300_s16, 3 }
  0x18   : > { %v313_v9 = vld [vmem:[%s1484_s15 + $0x20] sm:$0xff]  ;;  %v327_v11 = vld [vmem:[%s1484_s15 + $0x90] sm:$0xff]  ;;  %v314_v12 = vld [vmem:[%s1484_s15 + $0x28] sm:$0xff]  ;;  %s2154_s24 = scalar_lea.vmem %s2240_s7, %s1251_s19 }
  0x19   : > { %1273 = vmatmul.msk.f32.vlgmr.msra.gmra.mxu3 %vm334_vm1, %v327_v11  ;;  %v323_v13 = vld [vmem:[%s1484_s15 + $0x70] sm:$0xff]  ;;  %v328_v14 = vld [vmem:[%s1484_s15 + $0x98] sm:$0xff]  ;;  %v325_v18 = vld [vmem:[%s1484_s15 + $0x80] sm:$0xff] }
  0x1a   : > { %v315_v15 = vld [vmem:[%s1484_s15 + $0x30] sm:$0xff]  ;;  %v324_v16 = vld [vmem:[%s1484_s15 + $0x78] sm:$0xff]  ;;  %v317_v19 = vld [vmem:[%s1484_s15 + $0x40] sm:$0xff] }
  0x1b   : > { %v316_v17 = vld [vmem:[%s1484_s15 + $0x38] sm:$0xff]  ;;  %v326_v20 = vld [vmem:[%s1484_s15 + $0x88] sm:$0xff] }
  0x1e   : > { %1256 = vmatmul.msk.f32.gmra.mxu0 %vm334_vm1, %v310_v3  ;;  %1265 = vmatmul.msk.f32.gmra.mxu2 %vm334_vm1, %v319_v4 }
  0x21   : > { %1274 = vmatmul.msk.f32.gmra.mxu3 %vm334_vm1, %v328_v14 }
  0x26   : > { %1257 = vmatmul.msk.f32.gmra.mxu0 %vm334_vm1, %v311_v5  ;;  %1266 = vmatmul.msk.f32.gmra.mxu2 %vm334_vm1, %v320_v6  ;;  %v1580_v5 = vperm.slane %v305_v39, 4 }
  0x2e   : > { %1258 = vmatmul.msk.f32.gmra.mxu0 %vm334_vm1, %v312_v7  ;;  %1267 = vmatmul.msk.f32.gmra.mxu2 %vm334_vm1, %v321_v8  ;;  %v1582_v7 = vperm.slane %v305_v39, 7  ;;  %v1584_v8 = vperm.slane %v305_v39, 5 }
  0x36   : > { %1259 = vmatmul.msk.f32.gmra.mxu0 %vm334_vm1, %v313_v9  ;;  %1268 = vmatmul.msk.f32.gmra.mxu2 %vm334_vm1, %v322_v10 }
  0x3e   : > { %1260 = vmatmul.msk.f32.gmra.mxu0 %vm334_vm1, %v314_v12  ;;  %1269 = vmatmul.msk.f32.gmra.mxu2 %vm334_vm1, %v323_v13 }
  0x46   : > { %1261 = vmatmul.msk.f32.gmra.mxu0 %vm334_vm1, %v315_v15  ;;  %1270 = vmatmul.msk.f32.gmra.mxu2 %vm334_vm1, %v324_v16 }
  0x4e   : > { %1262 = vmatmul.msk.f32.gmra.mxu0 %vm334_vm1, %v316_v17  ;;  %1271 = vmatmul.msk.f32.gmra.mxu2 %vm334_vm1, %v325_v18  ;;  %v1601_v17 = vperm.slane %v305_v39, 6 }
  0x56   : > { %1263 = vmatmul.msk.f32.gmra.mxu0 %vm334_vm1, %v317_v19  ;;  %1272 = vmatmul.msk.f32.gmra.mxu2 %vm334_vm1, %v326_v20 }
  0x93   : > { %v416_v21 = vpop.f32.mrf.mxu0 }
  0x94   : > { %v417_v25 = vadd.f32 %v1529_v23, %v416_v21 }
  0x96   : > { %v476_v28 = vmax.f32 %v417_v25, 0.0 }
  0x98   : > { %v506_v34 = vrot.slane %v476_v28, 1  ;;  %v537_v35 = vrot.slane %v476_v28, 7  ;;  %v676_v1 = vmul.f32 %v1557_v51, %v476_v28 }
  0x99   : > { %v443_v22 = vpop.f32.mrf.mxu2 }
  0x9a   : > { %v444_v32 = vadd.f32 %v1529_v23, %v443_v22  ;;  %v587_v46 = vsel %vm536_vm2, %v506_v34, %v537_v35 }
  0x9b   : > { %v419_v24 = vpop.f32.mrf.mxu0  ;;  %v659_v57 = vmul.f32 %v1544_v42, %v587_v46 }
  0x9c   : > { %v420_v26 = vadd.f32 %v1529_v23, %v419_v24  ;;  %v1546_v43 = vmax.f32 %v444_v32, 0.0 }
  0x9d   : > { %v692_v9 = vadd.f32 %v676_v1, %v659_v57 }
  0x9e   : > { %v477_v30 = vmax.f32 %v420_v26, 0.0  ;;  %v2243_v58 = vrot.slane %v1546_v43, 7  ;;  %v2242_v62 = vrot.slane %v1546_v43, 1  ;;  %v1605_v19 = vmul.f32 %v1557_v51, %v1546_v43 }
  0x9f   : > { %v1621_v28 = vmul.f32 %v1580_v5, %v1546_v43 }
  0xa0   : > { %v538_v37 = vrot.slane %v477_v30, 7  ;;  %v598_v40 = vrot.slane %v477_v30, 1  ;;  %v677_v4 = vmul.f32 %v1557_v51, %v477_v30  ;;  %v1598_v14 = vsel %vm597_vm3, %v2242_v62, %v2243_v58 }
  0xa1   : > { %v446_v27 = vpop.f32.mrf.mxu2  ;;  %2266 = vst [vmem:[#allocation5_spill] sm:$0xff] %v1598_v14 }
  0xa2   : > { %v447_v33 = vadd.f32 %v1529_v23, %v446_v27  ;;  %v539_v52 = vsel %vm536_vm2, %v537_v35, %v538_v37  ;;  %v599_v55 = vsel %vm597_vm3, %v506_v34, %v598_v40  ;;  %v648_v10 = vsel %vm597_vm3, %v598_v40, %v538_v37  ;;  %2267 = vst [vmem:[#allocation6_spill] sm:$0xff] %v1621_v28 }
  0xa3   : > { %v422_v29 = vpop.f32.mrf.mxu0  ;;  %v660_v61 = vmul.f32 %v1544_v42, %v539_v52  ;;  %v709_v2 = vmul.f32 %v1560_v53, %v599_v55  ;;  %v710_v22 = vmul.f32 %v1560_v53, %v648_v10  ;;  %v1617_v27 = vmul.f32 %v1560_v53, %v1598_v14 }
  0xa4   : > { %v423_v31 = vadd.f32 %v1529_v23, %v422_v29  ;;  %v1548_v44 = vmax.f32 %v447_v33, 0.0 }
  0xa5   : > { %v693_v13 = vadd.f32 %v677_v4, %v660_v61  ;;  %v725_v18 = vadd.f32 %v709_v2, %v692_v9 }
  0xa6   : > { %v1536_v36 = vmax.f32 %v423_v31, 0.0  ;;  %2263 = vst [vmem:[#allocation2_spill] sm:$0xff] %v1548_v44  ;;  %v511_v59 = vrot.slane %v1548_v44, 1  ;;  %v552_v60 = vrot.slane %v1548_v44, 7  ;;  %v686_v25 = vmul.f32 %v1557_v51, %v1548_v44 }
  0xa7   : > { %v726_v31 = vadd.f32 %v710_v22, %v693_v13  ;;  %v1626_v32 = vmul.f32 %v1580_v5, %v1548_v44 }
  0xa8   : > { %v507_v47 = vrot.slane %v1536_v36, 1  ;;  %v540_v48 = vrot.slane %v1536_v36, 7  ;;  %v1591_v12 = vsel %vm536_vm2, %v511_v59, %v552_v60  ;;  %v678_v35 = vmul.f32 %v1557_v51, %v1536_v36 }
  0xa9   : > { %v449_v41 = vpop.f32.mrf.mxu2  ;;  %2265 = vst [vmem:[#allocation4_spill] sm:$0xff] %v1591_v12  ;;  %v669_v24 = vmul.f32 %v1544_v42, %v1591_v12  ;;  %v775_v37 = vmul.f32 %v1580_v5, %v1536_v36 }
  0xaa   : > { %v450_v50 = vadd.f32 %v1529_v23, %v449_v41  ;;  %v588_v63 = vsel %vm536_vm2, %v507_v47, %v540_v48  ;;  %2268 = vst [vmem:[#allocation7_spill] sm:$0xff] %v1626_v32 }
  0xab   : > { %v425_v49 = vpop.f32.mrf.mxu0  ;;  %v742_v11 = vmul.f32 %v1564_v56, %v588_v63  ;;  %v661_v29 = vmul.f32 %v1544_v42, %v588_v63  ;;  %v1639_v40 = vadd.f32 %v686_v25, %v669_v24 }
  0xac   : > { %v426_v54 = vadd.f32 %v1529_v23, %v425_v49  ;;  %v1573_v0 = vmax.f32 %v450_v50, 0.0 }
  0xad   : > { %v758_v30 = vadd.f32 %v742_v11, %v725_v18  ;;  %v694_v50 = vadd.f32 %v678_v35, %v661_v29 }
  0xae   : > { %2264 = vst [vmem:[#allocation3_spill] sm:$0xff] %v1573_v0  ;;  %v1577_v3 = vmax.f32 %v426_v54, 0.0  ;;  %v553_v15 = vrot.slane %v1573_v0, 7  ;;  %v608_v41 = vrot.slane %v1573_v0, 1  ;;  %v687_v36 = vmul.f32 %v1557_v51, %v1573_v0 }
  0xaf   : > { %v791_v52 = vadd.f32 %v775_v37, %v758_v30 }
  0xb0   : > { %v541_v20 = vrot.slane %v1577_v3, 7  ;;  %v600_v21 = vrot.slane %v1577_v3, 1  ;;  %v1629_v33 = vsel %vm536_vm2, %v552_v60, %v553_v15  ;;  %v679_v4 = vmul.f32 %v1557_v51, %v1577_v3 }
  0xb1   : > { %v452_v6 = vpop.f32.mrf.mxu2  ;;  %2269 = vst [vmem:[#allocation8_spill] sm:$0xff] %v1629_v33  ;;  %v670_v54 = vmul.f32 %v1544_v42, %v1629_v33  ;;  %v1666_v10 = vsel %vm597_vm3, %v511_v59, %v608_v41  ;;  %v1689_v30 = vmul.f32 %v1564_v56, %v1629_v33 }
  0xb2   : > { %v542_v38 = vsel %vm536_vm2, %v540_v48, %v541_v20  ;;  %v601_v39 = vsel %vm597_vm3, %v507_v47, %v600_v21  ;;  %v1650_v47 = vsel %vm597_vm3, %v608_v41, %v553_v15  ;;  %v649_v61 = vsel %vm597_vm3, %v600_v21, %v541_v20  ;;  %2270 = vst [vmem:[#allocation9_spill] sm:$0xff] %v1666_v10 }
  0xb3   : > { %v428_v16 = vpop.f32.mrf.mxu0  ;;  %v662_v48 = vmul.f32 %v1544_v42, %v542_v38  ;;  %v808_v60 = vmul.f32 %v1584_v8, %v601_v39  ;;  %v743_v63 = vmul.f32 %v1564_v56, %v542_v38  ;;  %v453_v1 = vadd.f32 %v1529_v23, %v452_v6 }
  0xb4   : > { %v429_v26 = vadd.f32 %v1529_v23, %v428_v16  ;;  %v711_v9 = vmul.f32 %v1560_v53, %v601_v39  ;;  %v703_v13 = vadd.f32 %v687_v36, %v670_v54  ;;  %v720_v15 = vmul.f32 %v1560_v53, %v1650_v47 }
  0xb5   : > { %v1673_v6 = vmul.f32 %v1580_v5, %v1573_v0  ;;  %v695_v18 = vadd.f32 %v679_v4, %v662_v48  ;;  %v712_v20 = vmul.f32 %v1560_v53, %v649_v61  ;;  %v776_v21 = vmul.f32 %v1580_v5, %v1577_v3 }
  0xb6   : > { %v1631_v34 = vmax.f32 %v429_v26, 0.0  ;;  %v824_v59 = vadd.f32 %v808_v60, %v791_v52  ;;  %v759_v22 = vadd.f32 %v743_v63, %v726_v31  ;;  %v1682_v24 = vmul.f32 %v1560_v53, %v1666_v10  ;;  %v1696_v31 = vld [vmem:[%s2236_s3 + $0x8] ss:$0 sm:$0xff]  ;;  %v1713_v60 = vld [vmem:[%s2237_s4] ss:$0 sm:$0xff] }
  0xb7   : > { %v1684_v25 = vmax.f32 %v453_v1, 0.0  ;;  %v727_v29 = vadd.f32 %v711_v9, %v694_v50  ;;  %v1698_v38 = vadd.f32 %v720_v15, %v703_v13  ;;  %v809_v50 = vmul.f32 %v1584_v8, %v649_v61 }
  0xb8   : > { %v508_v45 = vrot.slane %v1631_v34, 1  ;;  %v543_v46 = vrot.slane %v1631_v34, 7  ;;  %v874_v3 = vmul.f32 %v1582_v7, %v1631_v34  ;;  %v1705_v52 = vadd.f32 %v712_v20, %v695_v18 }
  0xb9   : > { %v455_v49 = vpop.f32.mrf.mxu2  ;;  %2271 = vst [vmem:[#allocation10_spill] sm:$0xff] %v1698_v38  ;;  %v792_v63 = vadd.f32 %v776_v21, %v759_v22  ;;  %v555_v1 = vrot.slane %v1684_v25, 7  ;;  %v777_v13 = vmul.f32 %v1580_v5, %v1631_v34  ;;  %v688_v15 = vmul.f32 %v1557_v51, %v1684_v25 }
  0xba   : > { %v589_v57 = vsel %vm536_vm2, %v508_v45, %v543_v46  ;;  %v456_v4 = vadd.f32 %v1529_v23, %v455_v49  ;;  %v1732_v21 = vmul.f32 %v1580_v5, %v1684_v25 }
  0xbb   : > { %v431_v55 = vpop.f32.mrf.mxu0  ;;  %v841_v11 = vmul.f32 %v1601_v17, %v589_v57  ;;  %v744_v9 = vmul.f32 %v1564_v56, %v589_v57 }
  0xbc   : > { %v432_v2 = vadd.f32 %v1529_v23, %v431_v55 }
  0xbd   : > { %v857_v37 = vadd.f32 %v841_v11, %v824_v59  ;;  %v663_v59 = vmul.f32 %v1544_v42, %v589_v57 }
  0xbe   : > { %v1675_v16 = vmax.f32 %v432_v2, 0.0  ;;  %v680_v2 = vmul.f32 %v1557_v51, %v1631_v34 }
  0xbf   : > { %v890_v48 = vadd.f32 %v874_v3, %v857_v37 }
  0xc0   : > { %v602_v26 = vrot.slane %v1675_v16, 1  ;;  %v544_v54 = vrot.slane %v1675_v16, 7  ;;  %v1757_v58 = vadd.f32 %v680_v2, %v663_v59 }
  0xc1   : > { %v458_v35 = vpop.f32.mrf.mxu2 }
  0xc2   : > { %v459_v39 = vadd.f32 %v1529_v23, %v458_v35  ;;  %v1702_v41 = vsel %vm597_vm3, %v508_v45, %v602_v26  ;;  %v2241_v45 = vrot.slane %v1684_v25, 1  ;;  %v1739_v22 = vsel %vm536_vm2, %v543_v46, %v544_v54 }
  0xc3   : > { %v434_v36 = vpop.f32.mrf.mxu0  ;;  %v907_v55 = vmul.f32 %v1696_v31, %v1702_v41  ;;  %v1775_v2 = vsel %vm597_vm3, %v602_v26, %v544_v54  ;;  %v745_v12 = vmul.f32 %v1564_v56, %v1739_v22 }
  0xc4   : > { %v435_v61 = vadd.f32 %v1529_v23, %v434_v36  ;;  %v1728_v20 = vmax.f32 %v459_v39, 0.0  ;;  %v1744_v35 = vsel %vm536_vm2, %v2241_v45, %v555_v1  ;;  %v825_v39 = vadd.f32 %v809_v50, %v792_v63 }
  0xc5   : > { %v923_v11 = vadd.f32 %v907_v55, %v890_v48  ;;  %v671_v57 = vmul.f32 %v1544_v42, %v1744_v35  ;;  %v1750_v36 = vmax.f32 %v456_v4, 0.0  ;;  %v760_v55 = vadd.f32 %v744_v9, %v727_v29 }
  0xc6   : > { %v1726_v18 = vmax.f32 %v435_v61, 0.0  ;;  %v513_v46 = vrot.slane %v1728_v20, 1  ;;  %v558_v61 = vrot.slane %v1728_v20, 7  ;;  %v842_v45 = vmul.f32 %v1601_v17, %v1739_v22 }
  0xc7   : > { %v943_v49 = vadd.f32 %v1713_v60, %v923_v11  ;;  %v810_v50 = vmul.f32 %v1584_v8, %v1702_v41  ;;  %v1769_v63 = vmul.f32 %v1582_v7, %v1546_v43  ;;  %v1785_v32 = vadd.f32 %v688_v15, %v671_v57 }
  0xc8   : > { %v509_v37 = vrot.slane %v1726_v18, 1  ;;  %v2244_v3 = vrot.slane %v1726_v18, 7  ;;  %v858_v59 = vadd.f32 %v842_v45, %v825_v39  ;;  %v690_v57 = vmul.f32 %v1557_v51, %v1728_v20 }
  0xc9   : > { %v461_v48 = vpop.f32.mrf.mxu2  ;;  %v959_v34 = vmax.f32 %v943_v49, 0.0  ;;  %2272 = vst [vmem:[#allocation11_spill] sm:$0xff] %v1769_v63  ;;  %v875_v49 = vmul.f32 %v1582_v7, %v1675_v16 }
  0xca   : > { %v462_v11 = vadd.f32 %v1529_v23, %v461_v48  ;;  %v1765_v29 = vsel %vm536_vm2, %v509_v37, %v2244_v3  ;;  %v793_v48 = vadd.f32 %v777_v13, %v760_v55  ;;  %v1783_v3 = vmul.f32 %v1696_v31, %v1598_v14  ;;  %2275 = vst [vmem:[#allocation14_spill] sm:$0xff] %v1785_v32 }
  0xcb   : > { %v437_v62 = vpop.f32.mrf.mxu0  ;;  %1275 = vmatmul.msk.f32.vlgmr.msra.gmra.mxu1 %vm981_vm4, %v959_v34  ;;  %v843_v34 = vmul.f32 %v1601_v17, %v1765_v29  ;;  %v891_v45 = vadd.f32 %v875_v49, %v858_v59  ;;  %v908_v13 = vmul.f32 %v1696_v31, %v1775_v2  ;;  %v689_v59 = vmul.f32 %v1557_v51, %v1750_v36 }
  0xcc   : > { %v438_v4 = vadd.f32 %v1529_v23, %v437_v62  ;;  %v1772_v9 = vmax.f32 %v462_v11, 0.0  ;;  %2274 = vst [vmem:[#allocation13_spill] sm:$0xff] %v1783_v3  ;;  %v1789_v11 = vsel %vm536_vm2, %v513_v46, %v558_v61  ;;  %v826_v39 = vadd.f32 %v810_v50, %v793_v48 }
  0xcd   : > { %v673_v15 = vmul.f32 %v1544_v42, %v1789_v11  ;;  %v924_v0 = vadd.f32 %v908_v13, %v891_v45  ;;  %v1808_v50 = vmul.f32 %v1580_v5, %v1675_v16  ;;  %v2276_v48 = vrot.slane %v1750_v36, 7 }
  0xce   : > { %2273 = vst [vmem:[#allocation12_spill] sm:$0xff] %v1772_v9  ;;  %v1791_v26 = vmax.f32 %v438_v4, 0.0  ;;  %v612_v54 = vrot.slane %v1772_v9, 1  ;;  %v681_v4 = vmul.f32 %v1557_v51, %v1675_v16  ;;  %v859_v33 = vadd.f32 %v843_v34, %v826_v39 }
  0xcf   : > { %v1813_v55 = vsel %vm536_vm2, %v555_v1, %v2276_v48  ;;  %v559_v62 = vrot.slane %v1772_v9, 7  ;;  %v944_v45 = vadd.f32 %v1713_v60, %v924_v0  ;;  %v876_v13 = vmul.f32 %v1582_v7, %v1726_v18 }
  0xd0   : > { %v1818_v14 = vsel %vm597_vm3, %v513_v46, %v612_v54  ;;  %v2277_v34 = vrot.slane %v1791_v26, 1  ;;  %v706_v1 = vadd.f32 %v690_v57, %v673_v15  ;;  %v1848_v57 = vmul.f32 %v1582_v7, %v1750_v36 }
  0xd1   : > { %v464_v49 = vpop.f32.mrf.mxu2  ;;  %v723_v46 = vmul.f32 %v1560_v53, %v1818_v14  ;;  %v960_v0 = vmax.f32 %v944_v45, 0.0  ;;  %v892_v10 = vadd.f32 %v876_v13, %v859_v33  ;;  %v1842_v15 = vsel %vm536_vm2, %v558_v61, %v559_v62 }
  0xd2   : > { %v465_v32 = vadd.f32 %v1529_v23, %v464_v49  ;;  %v1824_v16 = vsel %vm597_vm3, %v509_v37, %v2277_v34  ;;  %v664_v49 = vmul.f32 %v1544_v42, %v1739_v22  ;;  %v1839_v34 = vmul.f32 %v1580_v5, %v1750_v36  ;;  %2280 = vst [vmem:[#allocation17_spill] sm:$0xff] %v1842_v15 }
  0xd3   : > { %v440_v28 = vpop.f32.mrf.mxu0  ;;  %v909_v37 = vmul.f32 %v1696_v31, %v1824_v16  ;;  %v674_v33 = vmul.f32 %v1544_v42, %v1842_v15  ;;  %v691_v45 = vmul.f32 %v1557_v51, %v1772_v9  ;;  %1276 = vmatmul.msk.f32.gmra.mxu1 %vm981_vm4, %v960_v0  ;;  %v672_v61 = vmul.f32 %v1544_v42, %v1813_v55 }
  0xd4   : > { %v441_v39 = vadd.f32 %v1529_v23, %v440_v28  ;;  %v1829_v48 = vmax.f32 %v465_v32, 0.0  ;;  %2279 = vst [vmem:[#allocation16_spill] sm:$0xff] %v1839_v34  ;;  %v713_v28 = vmul.f32 %v1560_v53, %v1702_v41  ;;  %v739_v44 = vadd.f32 %v723_v46, %v706_v1 }
  0xd5   : > { %v925_v13 = vadd.f32 %v909_v37, %v892_v10  ;;  %v697_v15 = vadd.f32 %v681_v4, %v664_v49  ;;  %v1870_v37 = vsel %vm597_vm3, %v612_v54, %v559_v62  ;;  %v707_v4 = vadd.f32 %v691_v45, %v674_v33 }
  0xd6   : > { %2278 = vst [vmem:[#allocation15_spill] sm:$0xff] %v1829_v48  ;;  %v561_v32 = vrot.slane %v1829_v48, 7  ;;  %v1859_v34 = vmax.f32 %v441_v39, 0.0  ;;  %v2281_v3 = vrot.slane %v1829_v48, 1  ;;  %v789_v1 = vmul.f32 %v1580_v5, %v1829_v48 }
  0xd7   : > { %v945_v10 = vadd.f32 %v1713_v60, %v925_v13  ;;  %2283 = vst [vmem:[#allocation19_spill] sm:$0xff] %v1870_v37  ;;  %v724_v22 = vmul.f32 %v1560_v53, %v1870_v37  ;;  %v714_v62 = vmul.f32 %v1560_v53, %v1775_v2  ;;  %v1891_v33 = vmul.f32 %v1580_v5, %v1728_v20 }
  0xd8   : > { %v1864_v38 = vsel %vm536_vm2, %v2281_v3, %v561_v32  ;;  %v547_v3 = vrot.slane %v1791_v26, 7  ;;  %v549_v49 = vrot.slane %v1859_v34, 7  ;;  %v729_v45 = vadd.f32 %v713_v28, %v1757_v58 }
  0xd9   : > { %2282 = vst [vmem:[#allocation18_spill] sm:$0xff] %v1864_v38  ;;  %v467_v0 = vpop.f32.mrf.mxu2  ;;  %v756_v41 = vmul.f32 %v1564_v56, %v1864_v38  ;;  %v961_v46 = vmax.f32 %v945_v10, 0.0  ;;  %v1885_v38 = vadd.f32 %v689_v59, %v672_v61  ;;  %v779_v10 = vmul.f32 %v1580_v5, %v1726_v18 }
  0xda   : > { %v468_v39 = vadd.f32 %v1529_v23, %v467_v0  ;;  %v682_v0 = vmul.f32 %v1557_v51, %v1726_v18  ;;  %2285 = vst [vmem:[#allocation21_spill] sm:$0xff] %v1891_v33  ;;  %v740_v59 = vadd.f32 %v724_v22, %v707_v4  ;;  %v665_v61 = vmul.f32 %v1544_v42, %v1765_v29 }
  0xdb   : > { %v772_v13 = vadd.f32 %v756_v41, %v739_v44  ;;  %2284 = vst [vmem:[#allocation20_spill] sm:$0xff] %v1885_v38  ;;  %v1898_v41 = vadd.f32 %v714_v62, %v697_v15  ;;  %1277 = vmatmul.msk.f32.gmra.mxu1 %vm981_vm4, %v961_v46  ;;  %v2287_v38 = vrot.slane %v1726_v18, 7  ;;  %v761_v58 = vadd.f32 %v745_v12, %v1705_v52 }
  0xdc   : > { %v1883_v54 = vmax.f32 %v468_v39, 0.0  ;;  %v510_v28 = vrot.slane %v1859_v34, 1  ;;  %v746_v22 = vmul.f32 %v1564_v56, %v1765_v29  ;;  %v1930_v46 = vmul.f32 %v1580_v5, %v1772_v9  ;;  %v470_v9 = vpop.f32.mrf.mxu3 }
  0xdd   : > { %v1896_v44 = vadd.f32 %v789_v1, %v772_v13  ;;  %v548_v33 = vsel %vm536_vm2, %v2287_v38, %v547_v3  ;;  %v2288_v1 = vrot.slane %v1546_v43, 7  ;;  %v811_v38 = vmul.f32 %v1584_v8, %v1775_v2 }
  0xde   : > { %v2256_v39 = vrot.slane %v1883_v54, 7  ;;  %v790_v52 = vmul.f32 %v1580_v5, %v1883_v54  ;;  %v794_v18 = vadd.f32 %v1808_v50, %v761_v58  ;;  %2290 = vst [vmem:[#allocation24_spill] sm:$0xff] %v1930_v46  ;;  %v666_v29 = vmul.f32 %v1544_v42, %v548_v33 }
  0xdf   : > { %2286 = vst [vmem:[#allocation22_spill] sm:$0xff] %v1896_v44  ;;  %v1912_v15 = vsel %vm536_vm2, %v549_v49, %v2288_v1  ;;  %v844_v13 = vmul.f32 %v1601_v17, %v548_v33  ;;  %v698_v1 = vadd.f32 %v682_v0, %v665_v61  ;;  %v683_v50 = vmul.f32 %v1557_v51, %v1791_v26 }
  0xe0   : > { %v1917_v4 = vsel %vm536_vm2, %v561_v32, %v2256_v39  ;;  %v715_v32 = vmul.f32 %v1560_v53, %v1824_v16  ;;  %v668_v2 = vmul.f32 %v1544_v42, %v1912_v15  ;;  %v827_v39 = vadd.f32 %v811_v38, %v794_v18 }
  0xe1   : > { %2289 = vst [vmem:[#allocation23_spill] sm:$0xff] %v1917_v4  ;;  %v757_v12 = vmul.f32 %v1564_v56, %v1917_v4  ;;  %v2291_v58 = vrot.slane %v1791_v26, 1  ;;  %v591_v4 = vsel %vm536_vm2, %v510_v28, %v549_v49  ;;  %v762_v46 = vadd.f32 %v746_v22, %v729_v45 }
  0xe2   : > { %v780_v48 = vmul.f32 %v1580_v5, %v1791_v26  ;;  %v860_v63 = vadd.f32 %v844_v13, %v827_v39  ;;  %v877_v0 = vmul.f32 %v1582_v7, %v1791_v26  ;;  %v812_v61 = vmul.f32 %v1584_v8, %v1824_v16 }
  0xe3   : > { %v773_v62 = vadd.f32 %v757_v12, %v740_v59  ;;  %v651_v44 = vsel %vm597_vm3, %v2291_v58, %v547_v3  ;;  %v731_v59 = vadd.f32 %v715_v32, %v698_v1  ;;  %v1953_v38 = vadd.f32 %v1529_v23, %v470_v9 }
  0xe4   : > { %v699_v3 = vadd.f32 %v683_v50, %v666_v29  ;;  %v701_v49 = vadd.f32 %v1605_v19, %v668_v2  ;;  %v893_v45 = vadd.f32 %v877_v0, %v860_v63  ;;  %v910_v22 = vmul.f32 %v1696_v31, %v651_v44 }
  0xe5   : > { %v1946_v37 = vadd.f32 %v790_v52, %v773_v62  ;;  %v667_v12 = vmul.f32 %v1544_v42, %v591_v4  ;;  %v684_v39 = vmul.f32 %v1557_v51, %v1859_v34  ;;  %v716_v26 = vmul.f32 %v1560_v53, %v651_v44 }
  0xe6   : > { %v2292_v52 = vrot.slane %v1546_v43, 1  ;;  %v795_v18 = vadd.f32 %v779_v10, %v762_v46  ;;  %v781_v9 = vmul.f32 %v1580_v5, %v1859_v34  ;;  %v747_v19 = vmul.f32 %v1564_v56, %v548_v33 }
  0xe7   : > { %v926_v63 = vadd.f32 %v910_v22, %v893_v45  ;;  %v845_v32 = vmul.f32 %v1601_v17, %v591_v4  ;;  %v614_v42 = vrot.slane %v1883_v54, 1  ;;  %v1969_v29 = vadd.f32 %v716_v26, %v699_v3 }
  0xe8   : > { %v607_v16 = vsel %vm597_vm3, %v510_v28, %v2292_v52  ;;  %v813_v51 = vmul.f32 %v1584_v8, %v651_v44  ;;  %v828_v13 = vadd.f32 %v812_v61, %v795_v18  ;;  %v700_v2 = vadd.f32 %v684_v39, %v667_v12 }
  0xe9   : > { %v946_v43 = vadd.f32 %v1713_v60, %v926_v63  ;;  %v717_v10 = vmul.f32 %v1560_v53, %v607_v16  ;;  %v734_v28 = vadd.f32 %v1617_v27, %v701_v49  ;;  %v748_v5 = vmul.f32 %v1564_v56, %v591_v4 }
  0xea   : > { %v814_v33 = vmul.f32 %v1584_v8, %v607_v16  ;;  %v861_v46 = vadd.f32 %v845_v32, %v828_v13  ;;  %v878_v62 = vmul.f32 %v1582_v7, %v1859_v34  ;;  %v911_v50 = vmul.f32 %v1696_v31, %v607_v16 }
  0xeb   : > { %v962_v1 = vmax.f32 %v946_v43, 0.0  ;;  %v767_v44 = vadd.f32 %v1689_v30, %v734_v28  ;;  %v763_v58 = vadd.f32 %v747_v19, %v1898_v41  ;;  %v817_v61 = vmul.f32 %v1584_v8, %v1650_v47 }
  0xec   : > { %v894_v0 = vadd.f32 %v878_v62, %v861_v46  ;;  %v2293_v27 = vrot.slane %v1750_v36, 1  ;;  %v2294_v4 = vrot.slane %v1684_v25, 1  ;;  %v735_v34 = vadd.f32 %v1682_v24, %v1639_v40 }
  0xed   : > { %1278 = vmatmul.msk.f32.gmra.mxu1 %vm981_vm4, %v962_v1  ;;  %v800_v30 = vadd.f32 %v1673_v6, %v767_v44  ;;  %v796_v49 = vadd.f32 %v780_v48, %v763_v58  ;;  %v846_v41 = vmul.f32 %v1601_v17, %v1912_v15  ;;  %v752_v45 = vmul.f32 %v1564_v56, %v1744_v35  ;;  %v2298_v44 = vld [vmem:[#allocation4_spill] sm:$0xff] }
  0xee   : > { %v1989_v3 = vsel %vm597_vm3, %v2294_v4, %v2293_v27  ;;  %v1999_v22 = vadd.f32 %v717_v10, %v700_v2  ;;  %v927_v12 = vadd.f32 %v911_v50, %v894_v0  ;;  %v2295_v39 = vrot.slane %v1750_v36, 7  ;;  %v2299_v0 = vld [vmem:[#allocation10_spill] sm:$0xff] }
  0xef   : > { %v2296_v26 = vmov %v2293_v27  ;;  %v850_v24 = vmul.f32 %v1601_v17, %v1813_v55  ;;  %v833_v6 = vadd.f32 %v817_v61, %v800_v30  ;;  %v829_v48 = vadd.f32 %v813_v51, %v796_v49  ;;  %v2300_v27 = vld [vmem:[#allocation13_spill] sm:$0xff]  ;;  %v2301_v30 = vld [vmem:[#allocation2_spill] sm:$0xff]  ;;  %v2302_v49 = vld [vmem:[#allocation16_spill] sm:$0xff] }
  0xf0   : > { %v654_v40 = vsel %vm597_vm3, %v2296_v26, %v2295_v39  ;;  %v768_v52 = vadd.f32 %v752_v45, %v735_v34  ;;  %v818_v16 = vmul.f32 %v1584_v8, %v1989_v3  ;;  %v947_v18 = vadd.f32 %v1713_v60, %v927_v12  ;;  %v2303_v45 = vld [vmem:[#allocation17_spill] sm:$0xff] }
  0xf1   : > { %v916_v19 = vmul.f32 %v1696_v31, %v654_v40  ;;  %v721_v63 = vmul.f32 %v1560_v53, %v1989_v3  ;;  %v764_v32 = vadd.f32 %v748_v5, %v731_v59  ;;  %v866_v36 = vadd.f32 %v850_v24, %v833_v6  ;;  %v2297_v5 = vld [vmem:[#allocation11_spill] sm:$0xff] }
  0xf2   : > { %v862_v13 = vadd.f32 %v846_v41, %v829_v48  ;;  %v801_v43 = vadd.f32 %v1732_v21, %v768_v52  ;;  %v851_v2 = vmul.f32 %v1601_v17, %v1789_v11  ;;  %v884_v51 = vmul.f32 %v1582_v7, %v1728_v20  ;;  %v2304_v52 = vld [vmem:[#allocation9_spill] sm:$0xff] }
  0xf3   : > { %v917_v10 = vmul.f32 %v1696_v31, %v1818_v14  ;;  %v797_v28 = vadd.f32 %v781_v9, %v764_v32  ;;  %v753_v46 = vmul.f32 %v1564_v56, %v1813_v55  ;;  %v963_v62 = vmax.f32 %v947_v18, 0.0  ;;  %v2305_v18 = vld [vmem:[#allocation12_spill] sm:$0xff] }
  0xf4   : > { %v899_v59 = vadd.f32 %v1848_v57, %v866_v36  ;;  %v895_v1 = vadd.f32 %v2297_v5, %v862_v13  ;;  %v834_v50 = vadd.f32 %v818_v16, %v801_v43  ;;  %v847_v58 = vmul.f32 %v1601_v17, %v2298_v44  ;;  %v2306_v13 = vld [vmem:[#allocation6_spill] sm:$0xff] }
  0xf5   : > { %v830_v21 = vadd.f32 %v814_v33, %v797_v28  ;;  %v769_v61 = vadd.f32 %v753_v46, %v2299_v0  ;;  %v819_v20 = vmul.f32 %v1584_v8, %v654_v40  ;;  %1279 = vmatmul.msk.f32.gmra.mxu1 %vm981_vm4, %v963_v62  ;;  %v749_v57 = vmul.f32 %v1564_v56, %v1912_v15  ;;  %v2308_v62 = vld [vmem:[#allocation14_spill] sm:$0xff] }
  0xf6   : > { %v932_v9 = vadd.f32 %v916_v19, %v899_v59  ;;  %v928_v4 = vadd.f32 %v2300_v27, %v895_v1  ;;  %v867_v55 = vadd.f32 %v851_v2, %v834_v50  ;;  %v880_v33 = vmul.f32 %v1582_v7, %v2301_v30  ;;  %v2307_v2 = vld [vmem:[#allocation5_spill] sm:$0xff] }
  0xf7   : > { %v863_v34 = vadd.f32 %v847_v58, %v830_v21  ;;  %v802_v41 = vadd.f32 %v2302_v49, %v769_v61  ;;  %v852_v12 = vmul.f32 %v1601_v17, %v2303_v45  ;;  %v765_v6 = vadd.f32 %v749_v57, %v1969_v29  ;;  %v2309_v21 = vld [vmem:[#allocation8_spill] sm:$0xff]  ;;  %v2310_v58 = vld [vmem:[#allocation19_spill] sm:$0xff] }
  0xf8   : > { %v952_v39 = vadd.f32 %v1713_v60, %v932_v9  ;;  %v948_v26 = vadd.f32 %v1713_v60, %v928_v4  ;;  %v900_v24 = vadd.f32 %v884_v51, %v867_v55  ;;  %v913_v15 = vmul.f32 %v1696_v31, %v2304_v52  ;;  %v2311_v61 = vld [vmem:[#allocation3_spill] sm:$0xff] }
  0xf9   : > { %v896_v48 = vadd.f32 %v880_v33, %v863_v34  ;;  %v835_v16 = vadd.f32 %v819_v20, %v802_v41  ;;  %v885_v19 = vmul.f32 %v1582_v7, %v2305_v18  ;;  %v798_v43 = vadd.f32 %v2306_v13, %v765_v6  ;;  %v2312_v4 = vld [vmem:[#allocation15_spill] sm:$0xff]  ;;  %v2313_v34 = vld [vmem:[#allocation21_spill] sm:$0xff]  ;;  %v2314_v33 = vld [vmem:[#allocation18_spill] sm:$0xff] }
  0xfa   : > { %v968_v32 = vmax.f32 %v952_v39, 0.0  ;;  %v933_v36 = vadd.f32 %v917_v10, %v900_v24  ;;  %v815_v28 = vmul.f32 %v1584_v8, %v2307_v2  ;;  %v722_v46 = vmul.f32 %v1560_v53, %v654_v40  ;;  %v2316_v24 = vld [vmem:[#allocation20_spill] sm:$0xff]  ;;  %v2317_v18 = vld [vmem:[#allocation7_spill] sm:$0xff] }
  0xfb   : > { %v868_v51 = vadd.f32 %v852_v12, %v835_v16  ;;  %v737_v29 = vadd.f32 %v721_v63, %v2308_v62  ;;  %v754_v59 = vmul.f32 %v1564_v56, %v1789_v11  ;;  %v964_v5 = vmax.f32 %v948_v26, 0.0  ;;  %v2318_v62 = vld [vmem:[#allocation24_spill] sm:$0xff] }
  0xfc   : > { %1284 = vmatmul.msk.f32.vlgmr.msrb.gmra.mxu3 %vm981_vm4, %v968_v32  ;;  %v929_v1 = vadd.f32 %v913_v15, %v896_v48  ;;  %v831_v50 = vadd.f32 %v815_v28, %v798_v43  ;;  %v848_v10 = vmul.f32 %v1601_v17, %v2309_v21  ;;  %v918_v0 = vmul.f32 %v1696_v31, %v2310_v58  ;;  %v473_v43 = vpop.f32.mrf.mxu3 }
  0xfd   : > { %v881_v53 = vmul.f32 %v1582_v7, %v2311_v61  ;;  %v770_v40 = vadd.f32 %v754_v59, %v737_v29  ;;  %v820_v63 = vmul.f32 %v1584_v8, %v1818_v14  ;;  %1280 = vmatmul.msk.f32.gmra.mxu1 %vm981_vm4, %v964_v5  ;;  %v953_v11 = vadd.f32 %v1713_v60, %v933_v36 }
  0xfe   : > { %v901_v20 = vadd.f32 %v885_v19, %v868_v51  ;;  %v864_v9 = vadd.f32 %v848_v10, %v831_v50  ;;  %v750_v27 = vmul.f32 %v1564_v56, %v2298_v44  ;;  %v886_v55 = vmul.f32 %v1582_v7, %v2312_v4  ;;  %v2319_v50 = vld [vmem:[#allocation23_spill] sm:$0xff] }
  0xff   : > { %v2068_v57 = vmax.f32 %v1953_v38, 0.0  ;;  %v803_v30 = vadd.f32 %v2313_v34, %v770_v40  ;;  %v853_v14 = vmul.f32 %v1601_v17, %v2314_v33  ;;  %v2315_v49 = vrot.slane %v2312_v4, 1  ;;  %v2321_v34 = vld [vmem:[#allocation22_spill] sm:$0xff] }
 0x100   : > { %v949_v12 = vadd.f32 %v1713_v60, %v929_v1  ;;  %v897_v44 = vadd.f32 %v881_v53, %v864_v9  ;;  %v766_v39 = vadd.f32 %v750_v27, %v1999_v22  ;;  %v914_v38 = vmul.f32 %v1696_v31, %v1650_v47 }
 0x101   : > { %v615_v41 = vsel %vm597_vm3, %v2315_v49, %v614_v42  ;;  %v836_v26 = vadd.f32 %v820_v63, %v803_v30  ;;  %v738_v6 = vadd.f32 %v722_v46, %v2316_v24  ;;  %v755_v48 = vmul.f32 %v1564_v56, %v2303_v45 }
 0x102   : > { %v969_v15 = vmax.f32 %v953_v11, 0.0  ;;  %v934_v16 = vadd.f32 %v918_v0, %v901_v20  ;;  %v799_v19 = vadd.f32 %v2317_v18, %v766_v39  ;;  %v816_v32 = vmul.f32 %v1584_v8, %v2304_v52 }
 0x103   : > { %v515_v36 = vrot.slane %v2068_v57, 1  ;;  %v869_v13 = vadd.f32 %v853_v14, %v836_v26  ;;  %v771_v22 = vadd.f32 %v755_v48, %v738_v6  ;;  %v821_v47 = vmul.f32 %v1584_v8, %v2310_v58 }
 0x104   : > { %1285 = vmatmul.msk.f32.gmra.mxu3 %vm981_vm4, %v969_v15  ;;  %v965_v2 = vmax.f32 %v949_v12, 0.0  ;;  %v930_v28 = vadd.f32 %v914_v38, %v897_v44  ;;  %v832_v56 = vadd.f32 %v816_v32, %v799_v19  ;;  %v849_v45 = vmul.f32 %v1601_v17, %v1744_v35 }
 0x105   : > { %v564_v46 = vrot.slane %v2068_v57, 7  ;;  %v919_v52 = vmul.f32 %v1696_v31, %v615_v41  ;;  %v882_v51 = vmul.f32 %v1582_v7, %v1684_v25  ;;  %v804_v29 = vadd.f32 %v2318_v62, %v771_v22 }
 0x106   : > { %1281 = vmatmul.msk.f32.gmra.mxu1 %vm981_vm4, %v965_v2  ;;  %v954_v59 = vadd.f32 %v1713_v60, %v934_v16  ;;  %v902_v5 = vadd.f32 %v886_v55, %v869_v13  ;;  %v865_v1 = vadd.f32 %v849_v45, %v832_v56  ;;  %v854_v21 = vmul.f32 %v1601_v17, %v2319_v50  ;;  %v1293_v45 = vld [vmem:[%s1484_s15 + $0x10] sm:$0xff] }
 0x107   : > { %v474_v35 = vadd.f32 %v1529_v23, %v473_v43  ;;  %v837_v10 = vadd.f32 %v821_v47, %v804_v29  ;;  %v950_v58 = vadd.f32 %v1713_v60, %v930_v28  ;;  %v887_v25 = vmul.f32 %v1582_v7, %v1883_v54 }
 0x108   : > { %v898_v0 = vadd.f32 %v882_v51, %v865_v1  ;;  %v596_v61 = vsel %vm536_vm2, %v515_v36, %v564_v46  ;;  %v822_v53 = vmul.f32 %v1584_v8, %v615_v41  ;;  %v970_v40 = vmax.f32 %v954_v59, 0.0  ;;  %v1294_v51 = vld [vmem:[%s1484_s15 + $0x18] sm:$0xff] }
 0x109   : > { %v935_v63 = vadd.f32 %v919_v52, %v902_v5  ;;  %v915_v11 = vmul.f32 %v1696_v31, %v1989_v3  ;;  %v870_v20 = vadd.f32 %v854_v21, %v837_v10  ;;  %v2320_v9 = vrot.slane %v1883_v54, 7  ;;  %v1295_v5 = vld [vmem:[%s1484_s15 + $0x20] sm:$0xff] }
 0x10a   : > { %v495_v27 = vmax.f32 %v474_v35, 0.0  ;;  %v966_v4 = vmax.f32 %v950_v58, 0.0  ;;  %v838_v30 = vadd.f32 %v822_v53, %v2321_v34  ;;  %v855_v33 = vmul.f32 %v1601_v17, %v596_v61  ;;  %v1296_v35 = vld [vmem:[%s1484_s15 + $0x28] sm:$0xff]  ;;  %v1299_v34 = vld [vmem:[%s1484_s15 + $0x40] sm:$0xff] }
 0x10b   : > { %v656_v23 = vsel %vm597_vm3, %v614_v42, %v2320_v9  ;;  %v931_v55 = vadd.f32 %v915_v11, %v898_v0  ;;  %v955_v3 = vadd.f32 %v1713_v60, %v935_v63  ;;  %v903_v14 = vadd.f32 %v887_v25, %v870_v20  ;;  %v1297_v25 = vld [vmem:[%s1484_s15 + $0x30] sm:$0xff]  ;;  %v1298_v63 = vld [vmem:[%s1484_s15 + $0x38] sm:$0xff] }
 0x10c   : > { %1286 = vmatmul.msk.f32.gmra.mxu3 %vm981_vm4, %v970_v40  ;;  %v920_v49 = vmul.f32 %v1696_v31, %v656_v23  ;;  %v565_v41 = vrot.slane %v495_v27, 7  ;;  %v616_v54 = vrot.slane %v495_v27, 1  ;;  %v871_v12 = vadd.f32 %v855_v33, %v838_v30 }
 0x10d   : > { %v951_v42 = vadd.f32 %v1713_v60, %v931_v55  ;;  %v888_v44 = vmul.f32 %v1582_v7, %v2068_v57  ;;  %v823_v39 = vmul.f32 %v1584_v8, %v656_v23  ;;  %v971_v38 = vmax.f32 %v955_v3, 0.0  ;;  %v1302_v23 = vld [vmem:[%s1484_s15 + $0x58] sm:$0xff] }
 0x10e   : > { %1282 = vmatmul.msk.f32.gmra.mxu1 %vm981_vm4, %v966_v4  ;;  %v936_v26 = vadd.f32 %v920_v49, %v903_v14  ;;  %v566_v24 = vsel %vm536_vm2, %v564_v46, %v565_v41  ;;  %v617_v6 = vsel %vm597_vm3, %v515_v36, %v616_v54  ;;  %v889_v32 = vmul.f32 %v1582_v7, %v495_v27  ;;  %v1303_v14 = vld [vmem:[%s1484_s15 + $0x60] sm:$0xff] }
 0x10f   : > { %v967_v48 = vmax.f32 %v951_v42, 0.0  ;;  %v904_v15 = vadd.f32 %v888_v44, %v871_v12  ;;  %v839_v16 = vadd.f32 %v823_v39, %v1946_v37  ;;  %v856_v18 = vmul.f32 %v1601_v17, %v566_v24  ;;  %v1300_v42 = vld [vmem:[%s1484_s15 + $0x48] sm:$0xff] }
 0x110   : > { %v956_v57 = vadd.f32 %v1713_v60, %v936_v26  ;;  %v921_v8 = vmul.f32 %v1696_v31, %v617_v6  ;;  %v657_v22 = vsel %vm597_vm3, %v616_v54, %v565_v41 }
 0x111   : > { %v872_v19 = vadd.f32 %v856_v18, %v839_v16  ;;  %v922_v47 = vmul.f32 %v1696_v31, %v657_v22  ;;  %v2147_v31 = vld [vmem:[%s2239_s6] ss:$0 sm:$0xff] }
 0x112   : > { %v972_v13 = vmax.f32 %v956_v57, 0.0  ;;  %v937_v36 = vadd.f32 %v921_v8, %v904_v15  ;;  %v1305_v57 = vld [vmem:[%s1484_s15 + $0x70] sm:$0xff] }
 0x113   : > { %v905_v37 = vadd.f32 %v889_v32, %v872_v19 }
 0x114   : > { %1287 = vmatmul.msk.f32.gmra.mxu3 %vm981_vm4, %v971_v38  ;;  %v957_v17 = vadd.f32 %v1713_v60, %v937_v36  ;;  %v1304_v38 = vld [vmem:[%s1484_s15 + $0x68] sm:$0xff] }
 0x115   : > { %v938_v2 = vadd.f32 %v922_v47, %v905_v37 }
 0x116   : > { %1283 = vmatmul.msk.f32.gmra.mxu1 %vm981_vm4, %v967_v48  ;;  %v973_v43 = vmax.f32 %v957_v17, 0.0  ;;  %v1301_v48 = vld [vmem:[%s1484_s15 + $0x50] sm:$0xff]  ;;  %v1307_v17 = vld [vmem:[%s1484_s15 + $0x80] sm:$0xff] }
 0x117   : > { %v958_v28 = vadd.f32 %v1713_v60, %v938_v2 }
 0x119   : > { %v974_v7 = vmax.f32 %v958_v28, 0.0  ;;  %v1308_v28 = vld [vmem:[%s1484_s15 + $0x88] sm:$0xff] }
 0x11c   : > { %1288 = vmatmul.msk.f32.gmra.mxu3 %vm981_vm4, %v972_v13  ;;  %v1306_v13 = vld [vmem:[%s1484_s15 + $0x78] sm:$0xff] }
 0x124   : > { %1289 = vmatmul.msk.f32.gmra.mxu3 %vm981_vm4, %v973_v43 }
 0x12c   : > { %1290 = vmatmul.msk.f32.gmra.mxu3 %vm981_vm4, %v974_v7 }
 0x148   : > { %v1047_v56 = vpop.f32.mrf.mxu1 }
 0x149   : > { %v1048_v60 = vadd.f32 %v2147_v31, %v1047_v56 }
 0x14b   : > { %v1114_v46 = vadd.f32 %v1293_v45, %v1048_v60 }
 0x14d   : > { %1130 = vst.msk [vmem:[%s2154_s24] sm:$0xff] %vm334_vm1, %v1114_v46 }
 0x150   : > { %v1050_v52 = vpop.f32.mrf.mxu1 }
 0x151   : > { %v1051_v62 = vadd.f32 %v2147_v31, %v1050_v52 }
 0x153   : > { %v1115_v29 = vadd.f32 %v1294_v51, %v1051_v62 }
 0x155   : > { %1131 = vst.msk [vmem:[%s2154_s24 + $0x8] sm:$0xff] %vm334_vm1, %v1115_v29 }
 0x158   : > { %v1053_v59 = vpop.f32.mrf.mxu1 }
 0x159   : > { %v1054_v1 = vadd.f32 %v2147_v31, %v1053_v59 }
 0x15b   : > { %v1116_v50 = vadd.f32 %v1295_v5, %v1054_v1 }
 0x15d   : > { %1132 = vst.msk [vmem:[%s2154_s24 + $0x10] sm:$0xff] %vm334_vm1, %v1116_v50 }
 0x16a   : > { %v1056_v21 = vpop.f32.mrf.mxu1 }
 0x16b   : > { %v1057_v10 = vadd.f32 %v2147_v31, %v1056_v21 }
 0x16d   : > { %v1117_v58 = vadd.f32 %v1296_v35, %v1057_v10 }
 0x16f   : > { %1133 = vst.msk [vmem:[%s2154_s24 + $0x18] sm:$0xff] %vm334_vm1, %v1117_v58 }
 0x172   : > { %v1059_v0 = vpop.f32.mrf.mxu1 }
 0x173   : > { %v1060_v61 = vadd.f32 %v2147_v31, %v1059_v0 }
 0x175   : > { %v1118_v53 = vadd.f32 %v1297_v25, %v1060_v61 }
 0x177   : > { %1134 = vst.msk [vmem:[%s2154_s24 + $0x20] sm:$0xff] %vm334_vm1, %v1118_v53 }
 0x17a   : > { %v1062_v40 = vpop.f32.mrf.mxu1 }
 0x17b   : > { %v1063_v11 = vadd.f32 %v2147_v31, %v1062_v40 }
 0x17d   : > { %v1119_v20 = vadd.f32 %v1298_v63, %v1063_v11 }
 0x17f   : > { %v1074_v9 = vpop.f32.mrf.mxu3  ;;  %1135 = vst.msk [vmem:[%s2154_s24 + $0x28] sm:$0xff] %vm334_vm1, %v1119_v20 }
 0x180   : > { %v1075_v27 = vadd.f32 %v2147_v31, %v1074_v9 }
 0x182   : > { %v1123_v4 = vadd.f32 %v1302_v23, %v1075_v27 }
 0x183   : > { %v1065_v55 = vpop.f32.mrf.mxu1 }
 0x184   : > { %1139 = vst.msk [vmem:[%s2154_s24 + $0x48] sm:$0xff] %vm334_vm1, %v1123_v4  ;;  %v1066_v30 = vadd.f32 %v2147_v31, %v1065_v55 }
 0x186   : > { %v1120_v33 = vadd.f32 %v1299_v34, %v1066_v30 }
 0x187   : > { %v1077_v3 = vpop.f32.mrf.mxu3 }
 0x188   : > { %1136 = vst.msk [vmem:[%s2154_s24 + $0x30] sm:$0xff] %vm334_vm1, %v1120_v33  ;;  %v1078_v49 = vadd.f32 %v2147_v31, %v1077_v3 }
 0x18a   : > { %v1124_v41 = vadd.f32 %v1303_v14, %v1078_v49 }
 0x18b   : > { %v1068_v54 = vpop.f32.mrf.mxu1 }
 0x18c   : > { %1140 = vst.msk [vmem:[%s2154_s24 + $0x50] sm:$0xff] %vm334_vm1, %v1124_v41  ;;  %v1069_v12 = vadd.f32 %v2147_v31, %v1068_v54 }
 0x18e   : > { %v1121_v44 = vadd.f32 %v1300_v42, %v1069_v12 }
 0x18f   : > { %v1080_v39 = vpop.f32.mrf.mxu3 }
 0x190   : > { %1137 = vst.msk [vmem:[%s2154_s24 + $0x38] sm:$0xff] %vm334_vm1, %v1121_v44  ;;  %v1081_v26 = vadd.f32 %v2147_v31, %v1080_v39 }
 0x192   : > { %v1125_v24 = vadd.f32 %v1304_v38, %v1081_v26 }
 0x193   : > { %v1071_v6 = vpop.f32.mrf.mxu1 }
 0x194   : > { %1141 = vst.msk [vmem:[%s2154_s24 + $0x58] sm:$0xff] %vm334_vm1, %v1125_v24  ;;  %v1072_v15 = vadd.f32 %v2147_v31, %v1071_v6 }
 0x196   : > { %v1122_v16 = vadd.f32 %v1301_v48, %v1072_v15 }
 0x197   : > { %v1083_v18 = vpop.f32.mrf.mxu3 }
 0x198   : > { %1138 = vst.msk [vmem:[%s2154_s24 + $0x40] sm:$0xff] %vm334_vm1, %v1122_v16  ;;  %v1084_v8 = vadd.f32 %v2147_v31, %v1083_v18 }
 0x19a   : > { %v1126_v19 = vadd.f32 %v1305_v57, %v1084_v8 }
 0x19c   : > { %1142 = vst.msk [vmem:[%s2154_s24 + $0x60] sm:$0xff] %vm334_vm1, %v1126_v19 }
 0x19f   : > { %v1086_v32 = vpop.f32.mrf.mxu3 }
 0x1a0   : > { %v1087_v36 = vadd.f32 %v2147_v31, %v1086_v32 }
 0x1a2   : > { %v1127_v22 = vadd.f32 %v1306_v13, %v1087_v36 }
 0x1a4   : > { %1143 = vst.msk [vmem:[%s2154_s24 + $0x68] sm:$0xff] %vm334_vm1, %v1127_v22 }
 0x1a7   : > { %v1089_v37 = vpop.f32.mrf.mxu3 }
 0x1a8   : > { %v1090_v47 = vadd.f32 %v2147_v31, %v1089_v37 }
 0x1aa   : > { %v1128_v43 = vadd.f32 %v1307_v17, %v1090_v47 }
 0x1ac   : > { %1144 = vst.msk [vmem:[%s2154_s24 + $0x70] sm:$0xff] %vm334_vm1, %v1128_v43 }
 0x1af   : > { %v1092_v2 = vpop.f32.mrf.mxu3 }
 0x1b0   : > { %v1093_v7 = vadd.f32 %v2147_v31, %v1092_v2 }
 0x1b2   : > { %v1129_v56 = vadd.f32 %v1308_v28, %v1093_v7 }
 0x1b4   : > { %1145 = vst.msk [vmem:[%s2154_s24 + $0x78] sm:$0xff] %vm334_vm1, %v1129_v56 }
 0x1b5 PF: > { %s17_s28 = sadd.s32 1, %s1400_s28   ;;  %s2322_s24 = smov %s1392_s26 }
 0x1b6   : > { %p14_p7 = scmp.ge.s32.totalorder %s17_s28, 6   ;;  %s2323_s25 = smov %s1396_s27 }
 0x1b7   : > { %s2324_s26 = smov %s2327_s29  ;;  %s2325_s27 = smov %s2331_s30 }
 0x1b8   :  { %16 = sbr.rel (!%p14_p7) target bundleno = 3 (0x3), region = 80 }

</bundles_post_ra>
